<compile_context>
chip_gen: v7x
topology: tpu7x:2x2x1
jax: 0.10.0
libtpu: 0.0.40
codegen_flags: <defaults>
</compile_context>

<pallas_src>
import jax
import jax.numpy as jnp
from jax.experimental import pallas as pl
from jax.experimental.pallas import tpu as pltpu


def mlp_kernel(x_ref, w1_ref, b1_ref, w2_ref, b2_ref, w3_ref, b3_ref, o_ref):
    x = x_ref[...]                                              # (TB, F) f32

    # fc1 + ReLU   (MXU matmul, f32 accumulate)
    h1 = jnp.dot(x, w1_ref[...], preferred_element_type=jnp.float32)
    h1 = jnp.maximum(h1 + b1_ref[...], 0.0)                     # (TB, 64)

    # fc2 + ReLU
    h2 = jnp.dot(h1, w2_ref[...], preferred_element_type=jnp.float32)
    h2 = jnp.maximum(h2 + b2_ref[...], 0.0)                     # (TB, 32)

    # fc3 (N = 1): VPU multiply + lane reduction instead of a 1-column MXU
    # matmul (which would use 1/128..1/256 of the MXU and still pay its
    # push/pop latency).  w3_ref is stored as a (1, 32) row.
    y = jnp.sum(h2 * w3_ref[...], axis=-1, keepdims=True) + b3_ref[...]

    o_ref[...] = y.astype(o_ref.dtype)                          # (TB, 1)


def _round_up(a, m):
    return (a + m - 1) // m * m


def player_worth_predictor(x, params, *, tb_max=512):
    """x: (B, F) float32.  params: w1 (F,64), b1 (1,64), w2 (64,32), b2 (1,32),
    w3 (32,1), b3 (1,1)."""
    B, F = x.shape
    w1, b1 = params["w1"], params["b1"]
    w2, b2 = params["w2"], params["b2"]
    w3, b3 = params["w3"], params["b3"]
    w3_row = w3.reshape(1, -1)            # (1, 32) row layout for the VPU path

    # Batch tile: big (>=512 rows when available), multiple of 8 sublanes,
    # never larger than the padded batch.  Per-tile x is TB*F*4 bytes, so even
    # double-buffered this stays far inside v7x's scoped VMEM for typical F.
    TB = min(tb_max, _round_up(B, 8))
    TB = _round_up(TB, 8)
    B_pad = _round_up(B, TB)
    if B_pad != B:
        # Pad the tail instead of shrinking TB; padded rows are sliced off below.
        x = jnp.pad(x, ((0, B_pad - B), (0, 0)))
    n_tiles = B_pad // TB

    out = pl.pallas_call(
        mlp_kernel,
        out_shape=jax.ShapeDtypeStruct((B_pad, 1), jnp.float32),
        grid=(n_tiles,),
        in_specs=[
            # x: one (TB, F) tile per grid step -> auto double-buffered DMA.
            pl.BlockSpec((TB, F), lambda i: (i, 0)),
            # weights/biases: constant index_map -> VMEM-resident across steps.
            pl.BlockSpec(w1.shape, lambda i: (0, 0)),
            pl.BlockSpec(b1.shape, lambda i: (0, 0)),
            pl.BlockSpec(w2.shape, lambda i: (0, 0)),
            pl.BlockSpec(b2.shape, lambda i: (0, 0)),
            pl.BlockSpec(w3_row.shape, lambda i: (0, 0)),
            pl.BlockSpec(b3.shape, lambda i: (0, 0)),
        ],
        out_specs=pl.BlockSpec((TB, 1), lambda i: (i, 0)),
        compiler_params=pltpu.CompilerParams(
            # Batch tiles are independent -> shard across v7x's 2 TensorCores.
            dimension_semantics=("parallel",),
            # Safe on all of v5e/v6e/v7x; tiles + resident weights are tiny.
            vmem_limit_bytes=32 * 1024 * 1024,
        ),
    )(x, w1, b1, w2, b2, w3_row, b3)

    return out[:B]


def init_params(key, num_features):
    """Deterministic synthetic parameters matching nn.Linear shapes."""
    k1, k2, k3, k4, k5, k6 = jax.random.split(key, 6)

    def lin(kw, kb, fan_in, fan_out):
        bound = 1.0 / jnp.sqrt(fan_in)
        w = jax.random.uniform(kw, (fan_in, fan_out), jnp.float32, -bound, bound)
        b = jax.random.uniform(kb, (1, fan_out), jnp.float32, -bound, bound)
        return w, b

    w1, b1 = lin(k1, k2, num_features, 64)
    w2, b2 = lin(k3, k4, 64, 32)
    w3, b3 = lin(k5, k6, 32, 1)
    return {"w1": w1, "b1": b1, "w2": w2, "b2": b2, "w3": w3, "b3": b3}


def reference(x, p):
    h1 = jnp.maximum(x @ p["w1"] + p["b1"], 0.0)
    h2 = jnp.maximum(h1 @ p["w2"] + p["b2"], 0.0)
    return h2 @ p["w3"] + p["b3"]


if __name__ == "__main__":
    key = jax.random.PRNGKey(0)
    kx, kp, kx2 = jax.random.split(key, 3)

    F = 16
    params = init_params(kp, F)

    # Small test at the module's natural scale.
    B = 8
    x = jax.random.normal(kx, (B, F), jnp.float32)
    out = jax.block_until_ready(player_worth_predictor(x, params))
    ref = reference(x, params)
    assert out.shape == (B, 1)
    assert jnp.allclose(out, ref, atol=1e-5, rtol=1e-5), "mismatch vs reference (single tile)"

    # Exercise the multi-tile grid + non-divisible tail (pad-and-slice) path
    # with a tiny forced tile size.
    B2 = 20
    x2 = jax.random.normal(kx2, (B2, F), jnp.float32)
    out2 = jax.block_until_ready(player_worth_predictor(x2, params, tb_max=8))
    ref2 = reference(x2, params)
    assert out2.shape == (B2, 1)
    assert jnp.allclose(out2, ref2, atol=1e-5, rtol=1e-5), "mismatch vs reference (tiled + tail)"

    print("KERNEL_OK")
</pallas_src>

<mosaic_0001>
module attributes {stable_mosaic.version = 11 : i64} {
  func.func @mlp_kernel(%arg0: i32, %arg1: memref<8x16xf32, #tpu.memory_space<vmem>>, %arg2: memref<16x64xf32, #tpu.memory_space<vmem>>, %arg3: memref<1x64xf32, #tpu.memory_space<vmem>>, %arg4: memref<64x32xf32, #tpu.memory_space<vmem>>, %arg5: memref<1x32xf32, #tpu.memory_space<vmem>>, %arg6: memref<1x32xf32, #tpu.memory_space<vmem>>, %arg7: memref<1x1xf32, #tpu.memory_space<vmem>>, %arg8: memref<8x1xf32, #tpu.memory_space<vmem>>) attributes {dimension_semantics = [#tpu.dimension_semantics<parallel>], iteration_bounds = array<i64: 1>, scalar_prefetch = 0 : i64, scratch_operands = 0 : i64, tpu.core_type = #tpu.core_type<tc>, window_params = [{transform_indices = @transform_0, window_bounds = array<i64: 8, 16>}, {pipeline_mode = #tpu.pipeline_mode<synchronous>, transform_indices = @transform_1, window_bounds = array<i64: 16, 64>}, {pipeline_mode = #tpu.pipeline_mode<synchronous>, transform_indices = @transform_2, window_bounds = array<i64: 1, 64>}, {pipeline_mode = #tpu.pipeline_mode<synchronous>, transform_indices = @transform_3, window_bounds = array<i64: 64, 32>}, {pipeline_mode = #tpu.pipeline_mode<synchronous>, transform_indices = @transform_4, window_bounds = array<i64: 1, 32>}, {pipeline_mode = #tpu.pipeline_mode<synchronous>, transform_indices = @transform_5, window_bounds = array<i64: 1, 32>}, {pipeline_mode = #tpu.pipeline_mode<synchronous>, transform_indices = @transform_6, window_bounds = array<i64: 1, 1>}, {transform_indices = @transform_7, window_bounds = array<i64: 8, 1>}]} {
    %c0 = arith.constant 0 : index
    %c0_0 = arith.constant 0 : index
    %0 = vector.load %arg1[%c0, %c0_0] : memref<8x16xf32, #tpu.memory_space<vmem>>, vector<8x16xf32>
    %c0_1 = arith.constant 0 : index
    %c0_2 = arith.constant 0 : index
    %1 = vector.load %arg2[%c0_1, %c0_2] : memref<16x64xf32, #tpu.memory_space<vmem>>, vector<16x64xf32>
    %cst = arith.constant dense<0.000000e+00> : vector<8x64xf32>
    %2 = tpu.matmul %0, %1, %cst {dimension_numbers = #tpu.dot_dimension_numbers<[1], [0], [0], [1], [0, 0, 1, 1], [], []>} : vector<8x16xf32>, vector<16x64xf32>, vector<8x64xf32> -> vector<8x64xf32>
    %c0_3 = arith.constant 0 : index
    %c0_4 = arith.constant 0 : index
    %3 = vector.load %arg3[%c0_3, %c0_4] : memref<1x64xf32, #tpu.memory_space<vmem>>, vector<1x64xf32>
    %4 = vector.broadcast %3 : vector<1x64xf32> to vector<8x64xf32>
    %5 = arith.addf %2, %4 : vector<8x64xf32>
    %cst_5 = arith.constant 0.000000e+00 : f32
    %6 = vector.broadcast %cst_5 : f32 to vector<8x64xf32>
    %7 = arith.maximumf %5, %6 : vector<8x64xf32>
    %c0_6 = arith.constant 0 : index
    %c0_7 = arith.constant 0 : index
    %8 = vector.load %arg4[%c0_6, %c0_7] : memref<64x32xf32, #tpu.memory_space<vmem>>, vector<64x32xf32>
    %cst_8 = arith.constant dense<0.000000e+00> : vector<8x32xf32>
    %9 = tpu.matmul %7, %8, %cst_8 {dimension_numbers = #tpu.dot_dimension_numbers<[1], [0], [0], [1], [0, 0, 1, 1], [], []>} : vector<8x64xf32>, vector<64x32xf32>, vector<8x32xf32> -> vector<8x32xf32>
    %c0_9 = arith.constant 0 : index
    %c0_10 = arith.constant 0 : index
    %10 = vector.load %arg5[%c0_9, %c0_10] : memref<1x32xf32, #tpu.memory_space<vmem>>, vector<1x32xf32>
    %11 = vector.broadcast %10 : vector<1x32xf32> to vector<8x32xf32>
    %12 = arith.addf %9, %11 : vector<8x32xf32>
    %cst_11 = arith.constant 0.000000e+00 : f32
    %13 = vector.broadcast %cst_11 : f32 to vector<8x32xf32>
    %14 = arith.maximumf %12, %13 : vector<8x32xf32>
    %c0_12 = arith.constant 0 : index
    %c0_13 = arith.constant 0 : index
    %15 = vector.load %arg6[%c0_12, %c0_13] : memref<1x32xf32, #tpu.memory_space<vmem>>, vector<1x32xf32>
    %16 = vector.broadcast %15 : vector<1x32xf32> to vector<8x32xf32>
    %17 = arith.mulf %14, %16 : vector<8x32xf32>
    %cst_14 = arith.constant dense<0.000000e+00> : vector<8xf32>
    %18 = vector.multi_reduction <add>, %17, %cst_14 [1] : vector<8x32xf32> to vector<8xf32>
    %19 = vector.shape_cast %18 : vector<8xf32> to vector<8x1xf32>
    %c0_15 = arith.constant 0 : index
    %c0_16 = arith.constant 0 : index
    %20 = vector.load %arg7[%c0_15, %c0_16] : memref<1x1xf32, #tpu.memory_space<vmem>>, vector<1x1xf32>
    %21 = vector.broadcast %20 : vector<1x1xf32> to vector<8x1xf32>
    %22 = arith.addf %19, %21 : vector<8x1xf32>
    %c0_17 = arith.constant 0 : index
    %c0_18 = arith.constant 0 : index
    %23 = vector.load %arg8[%c0_17, %c0_18] : memref<8x1xf32, #tpu.memory_space<vmem>>, vector<8x1xf32>
    tpu.vector_store %arg8[%c0_17, %c0_18], %22 {strides = array<i32>} : memref<8x1xf32, #tpu.memory_space<vmem>>, vector<8x1xf32>,
    return
  }
  func.func @transform_0(%arg0: i32) -> (i32, i32) {
    %c0_i32 = arith.constant 0 : i32
    %c0_i32_0 = arith.constant 0 : i32
    return %arg0, %c0_i32 : i32, i32
  }
  func.func @transform_1(%arg0: i32) -> (i32, i32) {
    %c0_i32 = arith.constant 0 : i32
    %c0_i32_0 = arith.constant 0 : i32
    %c0_i32_1 = arith.constant 0 : i32
    return %c0_i32, %c0_i32_0 : i32, i32
  }
  func.func @transform_2(%arg0: i32) -> (i32, i32) {
    %c0_i32 = arith.constant 0 : i32
    %c0_i32_0 = arith.constant 0 : i32
    %c0_i32_1 = arith.constant 0 : i32
    return %c0_i32, %c0_i32_0 : i32, i32
  }
  func.func @transform_3(%arg0: i32) -> (i32, i32) {
    %c0_i32 = arith.constant 0 : i32
    %c0_i32_0 = arith.constant 0 : i32
    %c0_i32_1 = arith.constant 0 : i32
    return %c0_i32, %c0_i32_0 : i32, i32
  }
  func.func @transform_4(%arg0: i32) -> (i32, i32) {
    %c0_i32 = arith.constant 0 : i32
    %c0_i32_0 = arith.constant 0 : i32
    %c0_i32_1 = arith.constant 0 : i32
    return %c0_i32, %c0_i32_0 : i32, i32
  }
  func.func @transform_5(%arg0: i32) -> (i32, i32) {
    %c0_i32 = arith.constant 0 : i32
    %c0_i32_0 = arith.constant 0 : i32
    %c0_i32_1 = arith.constant 0 : i32
    return %c0_i32, %c0_i32_0 : i32, i32
  }
  func.func @transform_6(%arg0: i32) -> (i32, i32) {
    %c0_i32 = arith.constant 0 : i32
    %c0_i32_0 = arith.constant 0 : i32
    %c0_i32_1 = arith.constant 0 : i32
    return %c0_i32, %c0_i32_0 : i32, i32
  }
  func.func @transform_7(%arg0: i32) -> (i32, i32) {
    %c0_i32 = arith.constant 0 : i32
    %c0_i32_0 = arith.constant 0 : i32
    return %arg0, %c0_i32 : i32, i32
  }
}

</mosaic_0001>

<bundles_post_ra>
// kernel: tpu_custom_call.1
= control target key start
LH: loop header
LB: loop body
LE: loop exit
PB: predicated region body
PF: predicated region fallthrough
CT: control target
= control target key end

     0   :  { %v291_v0 = vmov 0.0|0.0   ;;  %vm292_vm0 = vmmov 0   ;;  %v293_v3 = vmov 0.0   ;;  %vm38_vm1 = vcmask 130048   ;;  %s382_s1 = inlined_call_operand.vmem [shape: f32[16,64], index: 1, kind: input, shape index: {}]   ;;  %s383_s3 = inlined_call_operand.vmem [shape: f32[64,32], index: 3, kind: input, shape index: {}]   ;;  %s384_s0 = inlined_call_operand.vmem [shape: f32[8,16], index: 0, kind: input, shape index: {}]   ;;  %s385_s2 = inlined_call_operand.vmem [shape: f32[1,64], index: 2, kind: input, shape index: {}]   ;;  %s386_s6 = inlined_call_operand.<no memory space> [shape: f32[1,1], index: 6, kind: input, shape index: {}]   ;;  %s387_s4 = inlined_call_operand.vmem [shape: f32[1,32], index: 4, kind: input, shape index: {}]   ;;  %s388_s5 = inlined_call_operand.vmem [shape: f32[1,32], index: 5, kind: input, shape index: {}]   ;;  %s389_s7 = inlined_call_operand.vmem [shape: f32[8,1], index: 7, kind: output, shape index: {}]  }
   0x1   :  { %273 = vmatprep.subr.bf16.mxu0 %v291_v0  ;;  %v29_v1 = vld [vmem:[%s382_s1] sm:$0xff]  ;;  %v30_v2 = vld [vmem:[%s382_s1 + $0x8] sm:$0xff]  ;;  %251 = vmatprep.mubr.msk.f32.mxu0 %vm292_vm0, %v293_v3  ;;  %v115_v7 = vld [vmem:[%s383_s3 + $0x10] sm:$0xff]  ;;  %vm128_vm2 = vcmask 523264   ;;  %v12_v23 = vstv %s386_s6  ;;  %vm211_vm3 = vcmask 261120   ;;  %vm223_vm4 = vcmask 7168  }
   0x2   :  { %v274_v4 = vpack.c.bf16 %v30_v2, %v29_v1  ;;  %276 = vmatprep.subr.bf16.mxu1 %v291_v0  ;;  %v113_v5 = vld [vmem:[%s383_s3] sm:$0xff]  ;;  %v114_v6 = vld [vmem:[%s383_s3 + $0x8] sm:$0xff]  ;;  %270 = vmatprep.mubr.msk.f32.mxu1 %vm292_vm0, %v293_v3  ;;  %v116_v9 = vld [vmem:[%s383_s3 + $0x18] sm:$0xff]  ;;  %13 = vst [vmem:[#allocation2] sm:$0x1] %v12_v23 }
   0x3   :  { %v277_v8 = vpack.c.bf16 %v114_v6, %v113_v5  ;;  %v28_v10 = vld [vmem:[%s384_s0] sm:$0xff]  ;;  %v280_v11 = vpack.c.bf16 %v116_v9, %v115_v7  ;;  %v118_v13 = vld [vmem:[%s383_s3 + $0x28] sm:$0xff]  ;;  %v119_v15 = vld [vmem:[%s383_s3 + $0x30] sm:$0xff] }
   0x4   :  { %275 = vmatpush3.bf16.msra.mxu0 %v274_v4  ;;  %v117_v12 = vld [vmem:[%s383_s3 + $0x20] sm:$0xff]  ;;  %v120_v16 = vld [vmem:[%s383_s3 + $0x38] sm:$0xff] }
   0x5   :  { %278 = vmatpush3.bf16.msra.mxu1 %v277_v8  ;;  %v283_v14 = vpack.c.bf16 %v118_v13, %v117_v12  ;;  %v286_v17 = vpack.c.bf16 %v120_v16, %v119_v15  ;;  %v229_v18 = vld [vmem:[%s385_s2] ss:$0 sm:$0xff] }
   0x6   :  { %279 = vmatprep.subr.bf16.mxu1 %v291_v0  ;;  %v231_v24 = vld [vmem:[%s387_s4] ss:$0 sm:$0xff] }
   0x7   :  { %252 = vmatmul.mubr.msk.f32.vlgmr.msra.gmra.mrb[0].mxu0 %vm38_vm1, %v28_v10  ;;  %v233_v28 = vld [vmem:[%s388_s5] ss:$0 sm:$0xff] }
   0x9   :  { %281 = vmatpush3.bf16.msra.mxu1 %v280_v11  ;;  %v234_v32 = vld [vmem:[#allocation2] ss:$0 sm:$0xff] }
   0xa   :  { %282 = vmatprep.subr.bf16.mxu1 %v291_v0 }
   0xd   :  { %284 = vmatpush3.bf16.msra.mxu1 %v283_v14 }
   0xe   :  { %285 = vmatprep.subr.bf16.mxu1 %v291_v0 }
  0x11   :  { %287 = vmatpush3.bf16.msra.mxu1 %v286_v17 }
  0xda   :  { %v108_v19 = vpop.f32.mrb[0].mxu0 }
  0xdb   :  { %v109_v20 = vadd.f32 %v229_v18, %v108_v19  ;;  %v253_v21 = vpop.f32.mrb[1].mxu0 }
  0xdd   :  { %v112_v22 = vmax.f32 %v109_v20, 0.0 }
  0xdf   :  { %271 = vmatmul.mubr.msk.f32.vlgmr.msra.gmra.mrb[0].mxu1 %vm128_vm2, %v112_v22 }
 0x1b2   :  { %v198_v25 = vpop.f32.mrb[0].mxu1 }
 0x1b3   :  { %v199_v26 = vadd.f32 %v231_v24, %v198_v25  ;;  %v272_v27 = vpop.f32.mrb[1].mxu1 }
 0x1b5   :  { %v202_v29 = vmax.f32 %v199_v26, 0.0 }
 0x1b7   :  { %v210_v30 = vmul.f32 %v233_v28, %v202_v29 }
 0x1b9   :  { %v212_v31 = vsel %vm211_vm3, %v210_v30, 0.0 }
 0x1ba   :  { %213 = vadd.xlane.f32.xlu0 %v212_v31 }
 0x247   :  { %v214_v33 = vpop.xlane.xlu0 %213 }
 0x248   :  { %v222_v34 = vadd.f32 %v234_v32, %v214_v33 }
 0x24a   :  { %224 = vst.msk [vmem:[%s389_s7] sm:$0xff] %vm223_vm4, %v222_v34 }

</bundles_post_ra>
